<compile_context>
chip_gen: v6e
topology: v6e:2x2x1
jax: 0.10.0
libtpu: 0.0.40
codegen_flags: <defaults>
</compile_context>

<pallas_src>
import functools

import jax
import jax.numpy as jnp
import numpy as np
from jax import lax
from jax.experimental import pallas as pl
from jax.experimental.pallas import tpu as pltpu

LANES = 128
SUBLANES = 8
MAX_TILE_ROWS = 4096                # 4096*128*4 B = 2 MiB per f32 input tile
ACC_ROWS_WIDE = 32                  # 4 independent (8,128) accumulation chains
VMEM_LIMIT_BYTES = 32 * 1024 * 1024


def _round_up(x, m):
    return ((x + m - 1) // m) * m


def _num_tensorcores() -> int:
    """Best-effort TensorCore count per device (1 on v5e/v6e, 2 on v7x)."""
    try:
        info = pltpu.get_tpu_info()
        for name in ("num_cores", "cores_per_chip", "tensorcore_count",
                     "num_tensorcores"):
            n = getattr(info, name, None)
            if isinstance(n, int) and n > 0:
                return max(1, min(2, n))
    except Exception:
        pass
    try:
        n = getattr(jax.devices()[0], "num_cores", None)
        if isinstance(n, int) and n > 0:
            return max(1, min(2, n))
    except Exception:
        pass
    return 1


def _qfocal_kernel(pred_ref, true_ref, out_ref, *,
                   gamma, alpha, smooth, total, inner_steps, need_mask):
    i = pl.program_id(1)

    @pl.when(i == 0)
    def _():
        out_ref[...] = jnp.zeros_like(out_ref)

    x = pred_ref[...].astype(jnp.float32)
    t = true_ref[...].astype(jnp.float32)

    # label smoothing (as in the module): true*(1 - smooth/0.5) + smooth
    # (applied only to the BCE target, exactly like the PyTorch forward)
    t_s = t * (1.0 - smooth / 0.5) + smooth

    # sigmoid via a single EUP tanh
    p = 0.5 * jnp.tanh(0.5 * x) + 0.5

    # BCE-with-logits, numerically stable and EUP-light:
    #   max(x,0) - x*t + softplus(-|x|),  softplus(-|x|) == -log(max(p, 1-p))
    bce = jnp.maximum(x, 0.0) - x * t_s - jnp.log(jnp.maximum(p, 1.0 - p))

    alpha_factor = t * alpha + (1.0 - t) * (1.0 - alpha)

    # |t - p| ** gamma, specialized at trace time for common gammas
    ad = jnp.abs(t - p)
    if gamma == 1.0:
        mod = ad
    elif gamma == 1.5:
        mod = ad * jnp.sqrt(ad)
    elif gamma == 2.0:
        mod = ad * ad
    else:
        mod = jnp.where(ad > 0.0,
                        jnp.exp(gamma * jnp.log(jnp.maximum(ad, 1e-30))),
                        0.0)

    loss = bce * alpha_factor * mod                       # (tile_rows, 128)

    if need_mask:
        # Mask out padded lanes / partial-edge-block garbage / duplicated
        # (clamped) blocks by flat element index.  int32 indexing limits this
        # to < 2^31 elements per tensor (plenty for a loss input).
        c = pl.program_id(0)
        tile_rows = loss.shape[0]
        row0 = (c * inner_steps + i) * tile_rows
        rows = lax.broadcasted_iota(jnp.int32, loss.shape, 0) + row0
        cols = lax.broadcasted_iota(jnp.int32, loss.shape, 1)
        loss = jnp.where(rows * LANES + cols < total, loss, 0.0)

    # Fold the tile into the resident per-core accumulator with pure VPU adds.
    acc_rows = out_ref.shape[0]
    if loss.shape[0] == acc_rows:
        partial = loss
    else:
        partial = loss.reshape(-1, acc_rows, LANES).sum(axis=0)
    out_ref[...] += partial


def qfocal_loss(pred, true, *, gamma=1.5, alpha=0.25, smooth=0.0):
    """QFocalLoss with BCEWithLogitsLoss(reduction='mean') semantics."""
    assert pred.shape == true.shape
    total = int(np.prod(pred.shape))
    assert total > 0

    ncores = _num_tensorcores()

    # Keep the caller's dtype through ravel/reshape (upcast happens in-kernel).
    pred_flat = jnp.ravel(pred)
    true_flat = jnp.ravel(true)

    # Only pad to a multiple of 8*128 so the lane-dense (rows,128) reshape is a
    # free bitcast.  Pad is <= 1023 elements, only when needed, and the padded
    # elements are masked out in-kernel (pad value irrelevant).
    chunk = SUBLANES * LANES
    padded_total = _round_up(total, chunk)
    if padded_total != total:
        pred_flat = jnp.pad(pred_flat, (0, padded_total - total))
        true_flat = jnp.pad(true_flat, (0, padded_total - total))

    n_rows = padded_total // LANES                     # multiple of 8
    tile_rows = min(MAX_TILE_ROWS, n_rows)             # multiple of 8
    acc_rows = ACC_ROWS_WIDE if tile_rows % ACC_ROWS_WIDE == 0 else SUBLANES

    n_blocks = -(-n_rows // tile_rows)
    inner_steps = -(-n_blocks // ncores)
    total_blocks = ncores * inner_steps
    need_mask = (total_blocks * tile_rows * LANES != total)

    pred2d = pred_flat.reshape(n_rows, LANES)
    true2d = true_flat.reshape(n_rows, LANES)

    if total_blocks == n_blocks:
        in_map = lambda c, i: (c * inner_steps + i, 0)            # noqa: E731
    else:
        # Extra grid points (round-up of blocks across cores) re-read the last
        # valid block; their contribution is fully masked in-kernel.
        last = n_blocks - 1
        in_map = lambda c, i: (jnp.minimum(c * inner_steps + i, last), 0)  # noqa: E731

    kernel = functools.partial(
        _qfocal_kernel,
        gamma=float(gamma), alpha=float(alpha), smooth=float(smooth),
        total=total, inner_steps=inner_steps, need_mask=need_mask)

    partials = pl.pallas_call(
        kernel,
        out_shape=jax.ShapeDtypeStruct((ncores * acc_rows, LANES), jnp.float32),
        grid_spec=pltpu.PrefetchScalarGridSpec(
            num_scalar_prefetch=0,
            grid=(ncores, inner_steps),
            in_specs=[
                pl.BlockSpec((tile_rows, LANES), in_map),
                pl.BlockSpec((tile_rows, LANES), in_map),
            ],
            out_specs=pl.BlockSpec((acc_rows, LANES), lambda c, i: (c, 0)),
        ),
        compiler_params=pltpu.CompilerParams(
            # outer axis may be sharded across TensorCores; inner axis is the
            # reduction (accumulator resident in the output block).
            dimension_semantics=("parallel", "arbitrary"),
            vmem_limit_bytes=VMEM_LIMIT_BYTES,
        ),
    )(pred2d, true2d)

    # 'mean' reduction (nn.BCEWithLogitsLoss default). Tiny wrapper-side op.
    # TODO(synk): reduction='none' would need an elementwise-output kernel.
    return jnp.sum(partials) / jnp.float32(total)


def _qfocal_loss_ref(pred, true, *, gamma=1.5, alpha=0.25, smooth=0.0):
    # pure-JAX reference for correctness check
    x = pred.astype(jnp.float32)
    t = true.astype(jnp.float32)
    t_s = t * (1.0 - smooth / 0.5) + smooth
    bce = jnp.maximum(x, 0.0) - x * t_s + jnp.log1p(jnp.exp(-jnp.abs(x)))
    p = jax.nn.sigmoid(x)
    alpha_factor = t * alpha + (1.0 - t) * (1.0 - alpha)
    mod = jnp.abs(t - p) ** gamma
    return jnp.mean(bce * alpha_factor * mod)


if __name__ == "__main__":
    key = jax.random.PRNGKey(0)
    k1, k2, k3, k4 = jax.random.split(key, 4)

    # Test 1: NCHW, lane-aligned total (2*4*16*16 = 2048), f32 inputs.
    pred = jax.random.normal(k1, (2, 4, 16, 16), dtype=jnp.float32)
    true = jax.random.bernoulli(k2, p=0.3, shape=(2, 4, 16, 16)).astype(jnp.float32)
    out = jax.block_until_ready(
        qfocal_loss(pred, true, gamma=1.5, alpha=0.25, smooth=0.0))
    ref = _qfocal_loss_ref(pred, true, gamma=1.5, alpha=0.25, smooth=0.0)
    np.testing.assert_allclose(np.asarray(out), np.asarray(ref),
                               rtol=1e-4, atol=1e-6)

    # Test 2: ragged total (3*5*7*11 = 1155) in bf16 with smoothing —
    # exercises the in-kernel index masking and narrow-dtype path.
    pred2 = jax.random.normal(k3, (3, 5, 7, 11), dtype=jnp.bfloat16)
    true2 = jax.random.bernoulli(k4, p=0.4, shape=(3, 5, 7, 11)).astype(jnp.bfloat16)
    out2 = jax.block_until_ready(
        qfocal_loss(pred2, true2, gamma=2.0, alpha=0.3, smooth=0.1))
    ref2 = _qfocal_loss_ref(pred2, true2, gamma=2.0, alpha=0.3, smooth=0.1)
    np.testing.assert_allclose(np.asarray(out2), np.asarray(ref2),
                               rtol=1e-3, atol=1e-6)

    print("KERNEL_OK")
</pallas_src>

<mosaic_0001>
module attributes {stable_mosaic.version = 11 : i64} {
  func.func @_qfocal_kernel(%arg0: i32, %arg1: i32, %arg2: memref<16x128xf32, #tpu.memory_space<vmem>>, %arg3: memref<16x128xf32, #tpu.memory_space<vmem>>, %arg4: memref<8x128xf32, #tpu.memory_space<vmem>>) attributes {dimension_semantics = [#tpu.dimension_semantics<parallel>, #tpu.dimension_semantics<arbitrary>], iteration_bounds = array<i64: 1, 1>, scalar_prefetch = 0 : i64, scratch_operands = 0 : i64, tpu.core_type = #tpu.core_type<tc>, window_params = [{transform_indices = @transform_0, window_bounds = array<i64: 16, 128>}, {transform_indices = @transform_1, window_bounds = array<i64: 16, 128>}, {transform_indices = @transform_2, window_bounds = array<i64: 8, 128>}]} {
    %c0_i32 = arith.constant 0 : i32
    %0 = arith.cmpi eq, %arg1, %c0_i32 : i32
    %1 = arith.extui %0 : i1 to i32
    %c0_i32_0 = arith.constant 0 : i32
    %2 = arith.cmpi ne, %1, %c0_i32_0 : i32
    scf.if %2 {
      %cst_18 = arith.constant 0.000000e+00 : f32
      %43 = vector.broadcast %cst_18 : f32 to vector<8x128xf32>
      %c0_19 = arith.constant 0 : index
      %c0_20 = arith.constant 0 : index
      %44 = vector.load %arg4[%c0_19, %c0_20] : memref<8x128xf32, #tpu.memory_space<vmem>>, vector<8x128xf32>
      tpu.vector_store %arg4[%c0_19, %c0_20], %43 {strides = array<i32>} : memref<8x128xf32, #tpu.memory_space<vmem>>, vector<8x128xf32>,
    } else {
    }
    %c0 = arith.constant 0 : index
    %c0_1 = arith.constant 0 : index
    %3 = vector.load %arg2[%c0, %c0_1] : memref<16x128xf32, #tpu.memory_space<vmem>>, vector<16x128xf32>
    %c0_2 = arith.constant 0 : index
    %c0_3 = arith.constant 0 : index
    %4 = vector.load %arg3[%c0_2, %c0_3] : memref<16x128xf32, #tpu.memory_space<vmem>>, vector<16x128xf32>
    %cst = arith.constant 1.000000e+00 : f32
    %5 = vector.broadcast %cst : f32 to vector<16x128xf32>
    %6 = arith.mulf %4, %5 : vector<16x128xf32>
    %cst_4 = arith.constant 0.000000e+00 : f32
    %7 = vector.broadcast %cst_4 : f32 to vector<16x128xf32>
    %8 = arith.addf %6, %7 : vector<16x128xf32>
    %cst_5 = arith.constant 5.000000e-01 : f32
    %9 = vector.broadcast %cst_5 : f32 to vector<16x128xf32>
    %10 = arith.mulf %9, %3 : vector<16x128xf32>
    %11 = math.tanh %10 : vector<16x128xf32>
    %cst_6 = arith.constant 5.000000e-01 : f32
    %12 = vector.broadcast %cst_6 : f32 to vector<16x128xf32>
    %13 = arith.mulf %12, %11 : vector<16x128xf32>
    %cst_7 = arith.constant 5.000000e-01 : f32
    %14 = vector.broadcast %cst_7 : f32 to vector<16x128xf32>
    %15 = arith.addf %13, %14 : vector<16x128xf32>
    %cst_8 = arith.constant 0.000000e+00 : f32
    %16 = vector.broadcast %cst_8 : f32 to vector<16x128xf32>
    %17 = arith.maximumf %3, %16 : vector<16x128xf32>
    %18 = arith.mulf %3, %8 : vector<16x128xf32>
    %19 = arith.subf %17, %18 : vector<16x128xf32>
    %cst_9 = arith.constant 1.000000e+00 : f32
    %20 = vector.broadcast %cst_9 : f32 to vector<16x128xf32>
    %21 = arith.subf %20, %15 : vector<16x128xf32>
    %22 = arith.maximumf %15, %21 : vector<16x128xf32>
    %23 = math.log %22 : vector<16x128xf32>
    %24 = arith.subf %19, %23 : vector<16x128xf32>
    %cst_10 = arith.constant 2.500000e-01 : f32
    %25 = vector.broadcast %cst_10 : f32 to vector<16x128xf32>
    %26 = arith.mulf %4, %25 : vector<16x128xf32>
    %cst_11 = arith.constant 1.000000e+00 : f32
    %27 = vector.broadcast %cst_11 : f32 to vector<16x128xf32>
    %28 = arith.subf %27, %4 : vector<16x128xf32>
    %cst_12 = arith.constant 7.500000e-01 : f32
    %29 = vector.broadcast %cst_12 : f32 to vector<16x128xf32>
    %30 = arith.mulf %28, %29 : vector<16x128xf32>
    %31 = arith.addf %26, %30 : vector<16x128xf32>
    %32 = arith.subf %4, %15 : vector<16x128xf32>
    %33 = math.absf %32 : vector<16x128xf32>
    %34 = math.sqrt %33 : vector<16x128xf32>
    %35 = arith.mulf %33, %34 : vector<16x128xf32>
    %36 = arith.mulf %24, %31 : vector<16x128xf32>
    %37 = arith.mulf %36, %35 : vector<16x128xf32>
    %38 = vector.shape_cast %37 : vector<16x128xf32> to vector<2x8x128xf32>
    %cst_13 = arith.constant dense<0.000000e+00> : vector<8x128xf32>
    %39 = vector.multi_reduction <add>, %38, %cst_13 [0] : vector<2x8x128xf32> to vector<8x128xf32>
    %c0_14 = arith.constant 0 : index
    %c0_15 = arith.constant 0 : index
    %40 = vector.load %arg4[%c0_14, %c0_15] : memref<8x128xf32, #tpu.memory_space<vmem>>, vector<8x128xf32>
    %41 = arith.addf %40, %39 : vector<8x128xf32>
    %c0_16 = arith.constant 0 : index
    %c0_17 = arith.constant 0 : index
    %42 = vector.load %arg4[%c0_16, %c0_17] : memref<8x128xf32, #tpu.memory_space<vmem>>, vector<8x128xf32>
    tpu.vector_store %arg4[%c0_16, %c0_17], %41 {strides = array<i32>} : memref<8x128xf32, #tpu.memory_space<vmem>>, vector<8x128xf32>,
    return
  }
  func.func @transform_0(%arg0: i32, %arg1: i32) -> (i32, i32) {
    %c1_i32 = arith.constant 1 : i32
    %0 = arith.muli %arg0, %c1_i32 : i32
    %1 = arith.addi %0, %arg1 : i32
    %c0_i32 = arith.constant 0 : i32
    %c0_i32_0 = arith.constant 0 : i32
    return %1, %c0_i32 : i32, i32
  }
  func.func @transform_1(%arg0: i32, %arg1: i32) -> (i32, i32) {
    %c1_i32 = arith.constant 1 : i32
    %0 = arith.muli %arg0, %c1_i32 : i32
    %1 = arith.addi %0, %arg1 : i32
    %c0_i32 = arith.constant 0 : i32
    %c0_i32_0 = arith.constant 0 : i32
    return %1, %c0_i32 : i32, i32
  }
  func.func @transform_2(%arg0: i32, %arg1: i32) -> (i32, i32) {
    %c0_i32 = arith.constant 0 : i32
    %c0_i32_0 = arith.constant 0 : i32
    return %arg0, %c0_i32 : i32, i32
  }
}

</mosaic_0001>

<bundles_post_ra>
// kernel: tpu_custom_call.1
= control target key start
LH: loop header
LB: loop body
LE: loop exit
PB: predicated region body
PF: predicated region fallthrough
CT: control target
= control target key end

     0   :  { %7 = vsyncpa [#allocation3], 0  ;;  %s252_s0 = inlined_call_operand.hbm [shape: f32[16,128], index: 0, kind: input, shape index: {}]   ;;  %s253_s1 = inlined_call_operand.hbm [shape: f32[16,128], index: 1, kind: input, shape index: {}]   ;;  %s254_s2 = inlined_call_operand.hbm [shape: f32[8,128], index: 2, kind: output, shape index: {}]  }
   0x1   :  { %8 = vsyncpa [#allocation6], 0 }
   0x2   :  { %9 = vsyncpa [#allocation4], 0  ;;  %s223_s9 = smov [#allocation2]  }
   0x3   :  { %s19_s10 = sshll.u32 %s223_s9, 4  ;;  %s20_s10 = int_to_ptr.vmem [resolvable:$true] %s19_s10 }
   0x4   :  { %s165_s11 = scalar_lea.vmem %s20_s10, 256  ;;  %p170_p1 = scmp.lt.s32.totalorder %s20_s10, %s20_s10 }
   0x5   :  { %p166_p0 = scmp.ne.s32.totalorder %s20_s10, %s165_s11  ;;  %p171_p2 = scmp.lt.s32.totalorder %s165_s11, %s165_s11 }
   0x7   :  { %p172_p3 = por %p171_p2, %p170_p1 }
   0x9   :  { %p173_p4 = pnand %p172_p3, %p166_p0 }
   0xb   :  { %176 = shalt.err (!%p173_p4)
}
   0xc   :  { %s224_s12 = smov 128   ;;  %s225_s13 = smov 8  }
   0xd   :  { %25 = dma.hbm_to_vmem [thread:$0]  %s252_s0, 256, %s20_s10, [#allocation3], %s224_s12, %s224_s12, %s225_s13  }
   0xe   :  { %s226_s16 = smov [#allocation5]  }
   0xf   :  { %s35_s17 = sshll.u32 %s226_s16, 4  ;;  %s36_s17 = int_to_ptr.vmem [resolvable:$true] %s35_s17 }
  0x10   :  { %s185_s18 = scalar_lea.vmem %s36_s17, 256  ;;  %p190_p6 = scmp.lt.s32.totalorder %s36_s17, %s36_s17 }
  0x11   :  { %p186_p5 = scmp.ne.s32.totalorder %s36_s17, %s185_s18  ;;  %p191_p7 = scmp.lt.s32.totalorder %s185_s18, %s185_s18 }
  0x13   :  { %p192_p8 = por %p191_p7, %p190_p6 }
  0x15   :  { %p193_p9 = pnand %p192_p8, %p186_p5 }
  0x17   :  { %196 = shalt.err (!%p193_p9)
}
  0x18   :  { %41 = dma.hbm_to_vmem [thread:$0]  %s253_s1, 256, %s36_s17, [#allocation6], %s224_s12, %s224_s12, %s225_s13  }
  0x19   :  { %217 = dma.done.wait [#allocation3], 256  }
  0x1a   :  { %218 = vsyncadd [#allocation3], 4294967040 }
  0x1b   :  { %219 = dma.done.wait [#allocation6], 256  }
  0x1c   :  { %220 = vsyncadd [#allocation6], 4294967040  ;;  %v57_v0 = vld [vmem:[#allocation2] sm:$0xff]  ;;  %v58_v1 = vld [vmem:[#allocation2 + $0x8] sm:$0xff]  ;;  %s227_s0 = smov [#allocation7]  }
  0x1d   :  { %v63_v2 = vmul.f32 0.5, %v57_v0  ;;  %v64_v3 = vmul.f32 0.5, %v58_v1  ;;  %v59_v7 = vld [vmem:[#allocation5] sm:$0xff]  ;;  %v60_v9 = vld [vmem:[#allocation5 + $0x8] sm:$0xff]  ;;  %v71_v22 = vmax.f32 %v57_v0, 0.0  ;;  %v72_v24 = vmax.f32 %v58_v1, 0.0 }
  0x1e   :  { %v89_v20 = vsub.f32 1.0, %v59_v7  ;;  %v90_v21 = vsub.f32 1.0, %v60_v9  ;;  %v73_v23 = vmul.f32 %v59_v7, %v57_v0  ;;  %v74_v25 = vmul.f32 %v60_v9, %v58_v1  ;;  %s129_s1 = sshll.u32 %s227_s0, 4  ;;  %s130_s1 = int_to_ptr.vmem [resolvable:$true] %s129_s1 }
  0x1f   :  { %145 = vtanh.f32 %v63_v2  ;;  %v87_v26 = vmul.f32 0.25, %v59_v7  ;;  %v88_v27 = vmul.f32 0.25, %v60_v9  ;;  %s197_s21 = scalar_lea.vmem %s130_s1, 128  ;;  %p202_p11 = scmp.lt.s32.totalorder %s130_s1, %s130_s1 }
  0x20   :  { %147 = vtanh.f32 %v64_v3  ;;  %v91_v28 = vmul.f32 0.75, %v89_v20  ;;  %v92_v29 = vmul.f32 0.75, %v90_v21  ;;  %v75_v30 = vsub.f32 %v71_v22, %v73_v23  ;;  %p198_p10 = scmp.ne.s32.totalorder %s130_s1, %s197_s21  ;;  %p203_p12 = scmp.lt.s32.totalorder %s197_s21, %s197_s21 }
  0x21   :  { %v76_v32 = vsub.f32 %v72_v24, %v74_v25 }
  0x22   :  { %v93_v35 = vadd.f32 %v91_v28, %v87_v26  ;;  %v94_v36 = vadd.f32 %v92_v29, %v88_v27  ;;  %p204_p13 = por %p203_p12, %p202_p11 }
  0x24   :  { %p205_p0 = pnand %p204_p13, %p198_p10 }
  0x2c   :  { %v146_v4 = vpop.eup %145 }
  0x2d   :  { %v148_v5 = vpop.eup %147  ;;  %v67_v6 = vmul.f32 0.5, %v146_v4 }
  0x2e   :  { %v68_v8 = vmul.f32 0.5, %v148_v5 }
  0x2f   :  { %v69_v10 = vadd.f32 0.5, %v67_v6 }
  0x30   :  { %v70_v11 = vadd.f32 0.5, %v68_v8 }
  0x31   :  { %v77_v12 = vsub.f32 1.0, %v69_v10  ;;  %v95_v13 = vsub.f32 %v59_v7, %v69_v10 }
  0x32   :  { %v78_v14 = vsub.f32 1.0, %v70_v11  ;;  %v96_v15 = vsub.f32 %v60_v9, %v70_v11 }
  0x33   :  { %v79_v16 = vmax.f32 %v69_v10, %v77_v12  ;;  %v97_v17 = vand.u32 2147483647, %v95_v13 }
  0x34   :  { %v80_v18 = vmax.f32 %v70_v11, %v78_v14  ;;  %v98_v19 = vand.u32 2147483647, %v96_v15 }
  0x35   :  { %149 = vlog2.f32 %v79_v16  ;;  %vm101_vm0 = vcmp.eq.f32.partialorder %v97_v17, inf  ;;  %vm103_vm1 = vcmp.eq.f32.partialorder %v97_v17, 0.0  ;;  %v104_v39 = vand.u32 2147483648, %v97_v17 }
  0x36   :  { %151 = vlog2.f32 %v80_v18  ;;  %vm108_vm2 = vcmp.eq.f32.partialorder %v98_v19, inf  ;;  %v111_v43 = vand.u32 2147483648, %v98_v19  ;;  %vm110_vm3 = vcmp.eq.f32.partialorder %v98_v19, 0.0 }
  0x37   :  { %153 = vrsqrt.f32 %v97_v17 }
  0x38   :  { %155 = vrsqrt.f32 %v98_v19 }
  0x42   :  { %v150_v31 = vpop.eup %149 }
  0x43   :  { %v152_v33 = vpop.eup %151  ;;  %v82_v34 = vmul.f32 0.6931472, %v150_v31 }
  0x44   :  { %v154_v37 = vpop.eup %153  ;;  %v84_v38 = vmul.f32 0.6931472, %v152_v33 }
  0x45   :  { %v156_v40 = vpop.eup %155  ;;  %v85_v41 = vsub.f32 %v75_v30, %v82_v34  ;;  %v100_v42 = vmul.f32 %v154_v37, %v97_v17 }
  0x46   :  { %v86_v44 = vsub.f32 %v76_v32, %v84_v38  ;;  %v107_v45 = vmul.f32 %v156_v40, %v98_v19 }
  0x47   :  { %v102_v46 = vsel %vm101_vm0, %v97_v17, %v100_v42  ;;  %v115_v47 = vmul.f32 %v93_v35, %v85_v41 }
  0x48   :  { %v105_v48 = vsel %vm103_vm1, %v104_v39, %v102_v46  ;;  %v109_v49 = vsel %vm108_vm2, %v98_v19, %v107_v45  ;;  %v116_v50 = vmul.f32 %v94_v36, %v86_v44 }
  0x49   :  { %v112_v51 = vsel %vm110_vm3, %v111_v43, %v109_v49  ;;  %v113_v52 = vmul.f32 %v105_v48, %v97_v17 }
  0x4a   :  { %v114_v53 = vmul.f32 %v112_v51, %v98_v19 }
  0x4b   :  { %v117_v54 = vmul.f32 %v115_v47, %v113_v52 }
  0x4c   :  { %v118_v55 = vmul.f32 %v116_v50, %v114_v53 }
  0x4e   :  { %v119_v56 = vadd.f32 %v118_v55, %v117_v54 }
  0x50   :  { %122 = vst [vmem:[#allocation7] sm:$0xff] %v119_v56 }
  0x51   :  { %208 = shalt.err (!%p205_p0)
}
  0x52   :  { %132 = dma.vmem_to_hbm [thread:$0]  %s130_s1, 128, %s254_s2, [#allocation4]  }
  0x53   :  { %221 = dma.done.wait [#allocation4], 128  }
  0x54   :  { %222 = vsyncadd [#allocation4], 4294967168 }
  0x55   :  { %136 = vsyncpa [#allocation3], 1 }
  0x56   :  { %137 = vsyncpa [#allocation6], 1 }
  0x57   :  { %138 = vsyncpa [#allocation4], 1 }

</bundles_post_ra>
